<compile_context>
chip_gen: v5e
topology: v5e:2x2
jax: 0.10.0
libtpu: 0.0.40
codegen_flags: <defaults>
</compile_context>

<pallas_src>
import jax
import jax.numpy as jnp
from jax.experimental import pallas as pl
from jax.experimental.pallas import tpu as pltpu


def _round_down(n, m):
    return (n // m) * m


def _block_diag(w, p):
    """(k, n) -> (p*k, p*n) block-diagonal with p copies of w (tiny, trace-time)."""
    if p == 1:
        return w
    k, n = w.shape
    out = jnp.zeros((p * k, p * n), w.dtype)
    for j in range(p):
        out = out.at[j * k:(j + 1) * k, j * n:(j + 1) * n].set(w)
    return out


def mlp_kernel(x_ref, w1_ref, b1_ref, w2_ref, b2_ref, w3_ref, b3_ref, o_ref):
    # x_ref: (TR, F*P) -- P original batch rows packed into one lane-dense row.
    x = x_ref[...]

    # fc1 + relu : (TR, F*P) @ block-diag(W1) (F*P, 8*P) -> (TR, 8*P)
    h1 = jnp.dot(x, w1_ref[...], preferred_element_type=jnp.float32) + b1_ref[...]
    h1 = jnp.maximum(h1, 0.0)

    # fc2 + relu : block-diag(W2) (8*P, 8*P)
    h2 = jnp.dot(h1, w2_ref[...], preferred_element_type=jnp.float32) + b2_ref[...]
    h2 = jnp.maximum(h2, 0.0)

    # fc3 + sigmoid : block-diag(W3) (8*P, P); b3 is an SMEM scalar.
    z = jnp.dot(h2, w3_ref[...], preferred_element_type=jnp.float32) + b3_ref[0, 0]
    y = jax.nn.sigmoid(z)                               # (TR, P) f32

    # Lane-dense store: (TR, P) -> (P, TR) via the (otherwise idle) XLU.
    o_ref[...] = jnp.transpose(y)


def small_neural_net(x, params, *, block_rows=16384):
    """x: (B, input_size) f32. params: (in,out)-layout weights, 2-D biases."""
    w1, b1, w2, b2, w3, b3 = (params["w1"], params["b1"], params["w2"],
                              params["b2"], params["w3"], params["b3"])
    B, F = x.shape

    # Pack P batch rows per (F*P)-wide row: fewer MXU pushes per grid step and
    # a lane-dense x DMA.  P is chosen to divide B so no padding pass is needed.
    P = 4 if B % 4 == 0 else (2 if B % 2 == 0 else 1)
    Bp, Fp = B // P, F * P
    xp = x.reshape(Bp, Fp)                 # contiguous row-major -> free reshape

    # Tiny (<= ~16 KiB) block-diagonal weight / tiled-bias prep (trace-time XLA ops).
    w1p = _block_diag(w1, P); b1p = jnp.tile(b1, (1, P))
    w2p = _block_diag(w2, P); b2p = jnp.tile(b2, (1, P))
    w3p = _block_diag(w3, P)

    # Packed-row tile.  VMEM per x buffer = tr * Fp * 4 B (x2 for double
    # buffering); at the defaults that is 2 x 2 MiB -- comfortably inside the
    # 32 MiB scoped VMEM default on v5e/v6e/v7x.
    tr_target = max(1, block_rows // P)
    if Bp <= tr_target:
        tr = Bp                                        # single full-extent block
    else:
        tr = max(128, _round_down(tr_target, 128))     # lane-dense output blocks
    grid = pl.cdiv(Bp, tr)   # ragged tail block is masked by Pallas -- no jnp.pad

    # Weights / small biases: constant index_map -> stay VMEM-resident.
    resident = lambda a: pl.BlockSpec(a.shape, lambda i: (0, 0))

    out = pl.pallas_call(
        mlp_kernel,
        out_shape=jax.ShapeDtypeStruct((P, Bp), jnp.float32),
        grid=(grid,),
        in_specs=[
            pl.BlockSpec((tr, Fp), lambda i: (i, 0)),            # streamed x tiles
            resident(w1p), resident(b1p),
            resident(w2p), resident(b2p),
            resident(w3p),
            pl.BlockSpec(memory_space=pltpu.MemorySpace.SMEM),   # b3 scalar
        ],
        out_specs=pl.BlockSpec((P, tr), lambda i: (0, i)),
        compiler_params=pltpu.CompilerParams(
            dimension_semantics=("parallel",)),
    )(xp, w1p, b1p, w2p, b2p, w3p, b3)

    # Layout plumbing only (4*B bytes): (P, Bp) -> (Bp, P) -> (B, 1).
    return out.T.reshape(B, 1)


def init_params(key, input_size):
    """Deterministic init mimicking nn.Linear's U(-1/sqrt(fan_in), 1/sqrt(fan_in))."""
    ks = jax.random.split(key, 6)

    def linear(kw, kb, fan_in, fan_out):
        bound = 1.0 / jnp.sqrt(fan_in)
        # PyTorch stores W as (out, in); we use (in, out) so the kernel does x @ W.
        w = jax.random.uniform(kw, (fan_in, fan_out), jnp.float32, -bound, bound)
        b = jax.random.uniform(kb, (1, fan_out), jnp.float32, -bound, bound)
        return w, b

    w1, b1 = linear(ks[0], ks[1], input_size, 8)
    w2, b2 = linear(ks[2], ks[3], 8, 8)
    w3, b3 = linear(ks[4], ks[5], 8, 1)
    return {"w1": w1, "b1": b1, "w2": w2, "b2": b2, "w3": w3, "b3": b3}


def _reference(x, p):
    h1 = jnp.maximum(x @ p["w1"] + p["b1"], 0.0)
    h2 = jnp.maximum(h1 @ p["w2"] + p["b2"], 0.0)
    return jax.nn.sigmoid(h2 @ p["w3"] + p["b3"])


if __name__ == "__main__":
    key = jax.random.PRNGKey(0)
    k1, k2, k3, kp = jax.random.split(key, 4)

    input_size = 32
    params = init_params(kp, input_size)

    # Small single-block case: B=32 -> pack factor 4, Bp=8, grid=1.
    x_small = jax.random.normal(k1, (32, input_size), jnp.float32)
    out_small = jax.block_until_ready(small_neural_net(x_small, params))
    assert out_small.shape == (32, 1)
    assert jnp.allclose(out_small, _reference(x_small, params), atol=1e-5), \
        "mismatch vs reference (small batch)"

    # Multi-tile + ragged tail: B=1000 -> P=4, Bp=250, tr=128, grid=2
    # (second block is ragged and masked on writeback; no wrapper padding).
    x_big = jax.random.normal(k2, (1000, input_size), jnp.float32)
    out_big = jax.block_until_ready(
        small_neural_net(x_big, params, block_rows=512))
    assert out_big.shape == (1000, 1)
    assert jnp.allclose(out_big, _reference(x_big, params), atol=1e-5), \
        "mismatch vs reference (tiled / ragged batch)"

    # Odd batch -> pack factor 1 fallback path.
    x_odd = jax.random.normal(k3, (25, input_size), jnp.float32)
    out_odd = jax.block_until_ready(small_neural_net(x_odd, params))
    assert out_odd.shape == (25, 1)
    assert jnp.allclose(out_odd, _reference(x_odd, params), atol=1e-5), \
        "mismatch vs reference (odd batch, P=1)"

    print("KERNEL_OK")
</pallas_src>

<mosaic_0001>
module attributes {stable_mosaic.version = 11 : i64} {
  func.func @mlp_kernel(%arg0: i32, %arg1: memref<8x128xf32, #tpu.memory_space<vmem>>, %arg2: memref<128x32xf32, #tpu.memory_space<vmem>>, %arg3: memref<1x32xf32, #tpu.memory_space<vmem>>, %arg4: memref<32x32xf32, #tpu.memory_space<vmem>>, %arg5: memref<1x32xf32, #tpu.memory_space<vmem>>, %arg6: memref<32x4xf32, #tpu.memory_space<vmem>>, %arg7: memref<1x1xf32, #tpu.memory_space<smem>>, %arg8: memref<4x8xf32, #tpu.memory_space<vmem>>) attributes {dimension_semantics = [#tpu.dimension_semantics<parallel>], iteration_bounds = array<i64: 1>, scalar_prefetch = 0 : i64, scratch_operands = 0 : i64, tpu.core_type = #tpu.core_type<tc>, window_params = [{transform_indices = @transform_0, window_bounds = array<i64: 8, 128>}, {pipeline_mode = #tpu.pipeline_mode<synchronous>, transform_indices = @transform_1, window_bounds = array<i64: 128, 32>}, {pipeline_mode = #tpu.pipeline_mode<synchronous>, transform_indices = @transform_2, window_bounds = array<i64: 1, 32>}, {pipeline_mode = #tpu.pipeline_mode<synchronous>, transform_indices = @transform_3, window_bounds = array<i64: 32, 32>}, {pipeline_mode = #tpu.pipeline_mode<synchronous>, transform_indices = @transform_4, window_bounds = array<i64: 1, 32>}, {pipeline_mode = #tpu.pipeline_mode<synchronous>, transform_indices = @transform_5, window_bounds = array<i64: 32, 4>}, {transform_indices = @transform_6, window_bounds = array<i64: 1, 1>}, {transform_indices = @transform_7, window_bounds = array<i64: 4, 8>}]} {
    %c0 = arith.constant 0 : index
    %c0_0 = arith.constant 0 : index
    %0 = vector.load %arg1[%c0, %c0_0] : memref<8x128xf32, #tpu.memory_space<vmem>>, vector<8x128xf32>
    %c0_1 = arith.constant 0 : index
    %c0_2 = arith.constant 0 : index
    %1 = vector.load %arg2[%c0_1, %c0_2] : memref<128x32xf32, #tpu.memory_space<vmem>>, vector<128x32xf32>
    %cst = arith.constant dense<0.000000e+00> : vector<8x32xf32>
    %2 = tpu.matmul %0, %1, %cst {dimension_numbers = #tpu.dot_dimension_numbers<[1], [0], [0], [1], [0, 0, 1, 1], [], []>} : vector<8x128xf32>, vector<128x32xf32>, vector<8x32xf32> -> vector<8x32xf32>
    %c0_3 = arith.constant 0 : index
    %c0_4 = arith.constant 0 : index
    %3 = vector.load %arg3[%c0_3, %c0_4] : memref<1x32xf32, #tpu.memory_space<vmem>>, vector<1x32xf32>
    %4 = vector.broadcast %3 : vector<1x32xf32> to vector<8x32xf32>
    %5 = arith.addf %2, %4 : vector<8x32xf32>
    %cst_5 = arith.constant 0.000000e+00 : f32
    %6 = vector.broadcast %cst_5 : f32 to vector<8x32xf32>
    %7 = arith.maximumf %5, %6 : vector<8x32xf32>
    %c0_6 = arith.constant 0 : index
    %c0_7 = arith.constant 0 : index
    %8 = vector.load %arg4[%c0_6, %c0_7] : memref<32x32xf32, #tpu.memory_space<vmem>>, vector<32x32xf32>
    %cst_8 = arith.constant dense<0.000000e+00> : vector<8x32xf32>
    %9 = tpu.matmul %7, %8, %cst_8 {dimension_numbers = #tpu.dot_dimension_numbers<[1], [0], [0], [1], [0, 0, 1, 1], [], []>} : vector<8x32xf32>, vector<32x32xf32>, vector<8x32xf32> -> vector<8x32xf32>
    %c0_9 = arith.constant 0 : index
    %c0_10 = arith.constant 0 : index
    %10 = vector.load %arg5[%c0_9, %c0_10] : memref<1x32xf32, #tpu.memory_space<vmem>>, vector<1x32xf32>
    %11 = vector.broadcast %10 : vector<1x32xf32> to vector<8x32xf32>
    %12 = arith.addf %9, %11 : vector<8x32xf32>
    %cst_11 = arith.constant 0.000000e+00 : f32
    %13 = vector.broadcast %cst_11 : f32 to vector<8x32xf32>
    %14 = arith.maximumf %12, %13 : vector<8x32xf32>
    %c0_12 = arith.constant 0 : index
    %c0_13 = arith.constant 0 : index
    %15 = vector.load %arg6[%c0_12, %c0_13] : memref<32x4xf32, #tpu.memory_space<vmem>>, vector<32x4xf32>
    %cst_14 = arith.constant dense<0.000000e+00> : vector<8x4xf32>
    %16 = tpu.matmul %14, %15, %cst_14 {dimension_numbers = #tpu.dot_dimension_numbers<[1], [0], [0], [1], [0, 0, 1, 1], [], []>} : vector<8x32xf32>, vector<32x4xf32>, vector<8x4xf32> -> vector<8x4xf32>
    %c0_15 = arith.constant 0 : index
    %c0_16 = arith.constant 0 : index
    %17 = memref.load %arg7[%c0_15, %c0_16] : memref<1x1xf32, #tpu.memory_space<smem>>
    %18 = vector.broadcast %17 : f32 to vector<8x4xf32>
    %19 = arith.addf %16, %18 : vector<8x4xf32>
    %20 = arith.negf %19 : vector<8x4xf32>
    %21 = math.exp %20 : vector<8x4xf32>
    %cst_17 = arith.constant 1.000000e+00 : f32
    %22 = vector.broadcast %cst_17 : f32 to vector<8x4xf32>
    %23 = arith.addf %22, %21 : vector<8x4xf32>
    %24 = arith.divf %22, %23 : vector<8x4xf32>
    %25 = tpu.transpose %24, [1, 0] : vector<8x4xf32> -> vector<4x8xf32>
    %c0_18 = arith.constant 0 : index
    %c0_19 = arith.constant 0 : index
    %26 = vector.load %arg8[%c0_18, %c0_19] : memref<4x8xf32, #tpu.memory_space<vmem>>, vector<4x8xf32>
    tpu.vector_store %arg8[%c0_18, %c0_19], %25 {strides = array<i32>} : memref<4x8xf32, #tpu.memory_space<vmem>>, vector<4x8xf32>,
    return
  }
  func.func @transform_0(%arg0: i32) -> (i32, i32) {
    %c0_i32 = arith.constant 0 : i32
    %c0_i32_0 = arith.constant 0 : i32
    return %arg0, %c0_i32 : i32, i32
  }
  func.func @transform_1(%arg0: i32) -> (i32, i32) {
    %c0_i32 = arith.constant 0 : i32
    %c0_i32_0 = arith.constant 0 : i32
    %c0_i32_1 = arith.constant 0 : i32
    return %c0_i32, %c0_i32_0 : i32, i32
  }
  func.func @transform_2(%arg0: i32) -> (i32, i32) {
    %c0_i32 = arith.constant 0 : i32
    %c0_i32_0 = arith.constant 0 : i32
    %c0_i32_1 = arith.constant 0 : i32
    return %c0_i32, %c0_i32_0 : i32, i32
  }
  func.func @transform_3(%arg0: i32) -> (i32, i32) {
    %c0_i32 = arith.constant 0 : i32
    %c0_i32_0 = arith.constant 0 : i32
    %c0_i32_1 = arith.constant 0 : i32
    return %c0_i32, %c0_i32_0 : i32, i32
  }
  func.func @transform_4(%arg0: i32) -> (i32, i32) {
    %c0_i32 = arith.constant 0 : i32
    %c0_i32_0 = arith.constant 0 : i32
    %c0_i32_1 = arith.constant 0 : i32
    return %c0_i32, %c0_i32_0 : i32, i32
  }
  func.func @transform_5(%arg0: i32) -> (i32, i32) {
    %c0_i32 = arith.constant 0 : i32
    %c0_i32_0 = arith.constant 0 : i32
    %c0_i32_1 = arith.constant 0 : i32
    return %c0_i32, %c0_i32_0 : i32, i32
  }
  func.func @transform_6(%arg0: i32) -> (i32, i32) {
    %c0_i32 = arith.constant 0 : i32
    %c0_i32_0 = arith.constant 0 : i32
    %c0_i32_1 = arith.constant 0 : i32
    return %c0_i32, %c0_i32_0 : i32, i32
  }
  func.func @transform_7(%arg0: i32) -> (i32, i32) {
    %c0_i32 = arith.constant 0 : i32
    %c0_i32_0 = arith.constant 0 : i32
    return %c0_i32, %arg0 : i32, i32
  }
}

</mosaic_0001>

<bundles_post_ra>
// kernel: tpu_custom_call.1
= control target key start
LH: loop header
LB: loop body
LE: loop exit
PB: predicated region body
PF: predicated region fallthrough
CT: control target
= control target key end

     0   :  { %s366_s0 = inlined_call_operand.vmem [shape: f32[8,128], index: 0, kind: input, shape index: {}]   ;;  %s367_s1 = inlined_call_operand.vmem [shape: f32[128,32], index: 1, kind: input, shape index: {}]   ;;  %s368_s2 = inlined_call_operand.vmem [shape: f32[1,32], index: 2, kind: input, shape index: {}]   ;;  %s369_s3 = inlined_call_operand.vmem [shape: f32[32,32], index: 3, kind: input, shape index: {}]   ;;  %s370_s4 = inlined_call_operand.vmem [shape: f32[1,32], index: 4, kind: input, shape index: {}]   ;;  %s371_s5 = inlined_call_operand.vmem [shape: f32[32,4], index: 5, kind: input, shape index: {}]   ;;  %s372_s6 = inlined_call_operand.<no memory space> [shape: f32[1,1], index: 6, kind: input, shape index: {}]   ;;  %s373_s7 = inlined_call_operand.hbm [shape: f32[4,8], index: 7, kind: output, shape index: {}]  }
   0x1   :  { %v44_v0 = vld [vmem:[%s367_s1 + $0x78] sm:$0xff]  ;;  %v43_v1 = vld [vmem:[%s367_s1 + $0x70] sm:$0xff]  ;;  %v42_v2 = vld [vmem:[%s367_s1 + $0x68] sm:$0xff] }
   0x2   :  { %49 = vmatpush.msra.mxu0 %v44_v0  ;;  %v41_v3 = vld [vmem:[%s367_s1 + $0x60] sm:$0xff]  ;;  %v73_v4 = vld [vmem:[%s369_s3 + $0x18] sm:$0xff] }
   0x3   :  { %v40_v5 = vld [vmem:[%s367_s1 + $0x58] sm:$0xff]  ;;  %94 = vmatpush.msra.mxu1 %v73_v4 }
   0x4   :  { %50 = vmatpush.msra.mxu0 %v43_v1 }
   0x6   :  { %51 = vmatpush.msra.mxu0 %v42_v2 }
   0x8   :  { %52 = vmatpush.msra.mxu0 %v41_v3 }
   0x9   :  { %13 = vsyncpa [#allocation4], 0  ;;  %v39_v6 = vld [vmem:[%s367_s1 + $0x50] sm:$0xff]  ;;  %v38_v7 = vld [vmem:[%s367_s1 + $0x48] sm:$0xff]  ;;  %vm78_vm0 = vcmask 261120   ;;  %v108_v33 = vstv %s372_s6  ;;  %s192_s8 = sshll.u32 %s373_s7, 4  ;;  %s193_s8 = int_to_ptr.hbm [resolvable:$true] %s192_s8 }
   0xa   :  { %53 = vmatpush.msra.mxu0 %v40_v5  ;;  %v37_v8 = vld [vmem:[%s367_s1 + $0x40] sm:$0xff]  ;;  %v36_v9 = vld [vmem:[%s367_s1 + $0x38] sm:$0xff]  ;;  %v35_v10 = vld [vmem:[%s367_s1 + $0x30] sm:$0xff]  ;;  %vm183_vm5 = vcmask 60416  }
   0xb   :  { %v34_v11 = vld [vmem:[%s367_s1 + $0x28] sm:$0xff]  ;;  %v33_v12 = vld [vmem:[%s367_s1 + $0x20] sm:$0xff]  ;;  %v32_v13 = vld [vmem:[%s367_s1 + $0x18] sm:$0xff] }
   0xc   :  { %54 = vmatpush.msra.mxu0 %v39_v6  ;;  %v31_v14 = vld [vmem:[%s367_s1 + $0x10] sm:$0xff]  ;;  %v30_v15 = vld [vmem:[%s367_s1 + $0x8] sm:$0xff]  ;;  %v29_v16 = vld [vmem:[%s367_s1] sm:$0xff] }
   0xd   :  { %v28_v17 = vld [vmem:[%s366_s0] sm:$0xff]  ;;  %v72_v18 = vld [vmem:[%s369_s3 + $0x10] sm:$0xff]  ;;  %v71_v19 = vld [vmem:[%s369_s3 + $0x8] sm:$0xff] }
   0xe   :  { %55 = vmatpush.msra.mxu0 %v38_v7  ;;  %95 = vmatpush.msra.mxu1 %v72_v18  ;;  %v70_v20 = vld [vmem:[%s369_s3] sm:$0xff]  ;;  %v106_v21 = vld [vmem:[%s371_s5 + $0x18] sm:$0xff]  ;;  %v105_v26 = vld [vmem:[%s371_s5 + $0x10] sm:$0xff] }
   0xf   :  { %124 = vmatpush.msra.mxu2 %v106_v21  ;;  %v206_v22 = vld [vmem:[%s368_s2] ss:$0 sm:$0xff]  ;;  %v104_v27 = vld [vmem:[%s371_s5 + $0x8] sm:$0xff] }
  0x10   :  { %56 = vmatpush.msra.mxu0 %v37_v8  ;;  %96 = vmatpush.msra.mxu1 %v71_v19  ;;  %v103_v28 = vld [vmem:[%s371_s5] sm:$0xff] }
  0x11   :  { %125 = vmatpush.msra.mxu2 %v105_v26  ;;  %v207_v29 = vld [vmem:[%s370_s4] ss:$0 sm:$0xff]  ;;  %s238_s4 = smov [#allocation3]  }
  0x12   :  { %57 = vmatpush.msra.mxu0 %v36_v9  ;;  %97 = vmatpush.msra.mxu1 %v70_v20  ;;  %s190_s5 = sshll.u32 %s238_s4, 4  ;;  %s191_s5 = int_to_ptr.vmem [resolvable:$true] %s190_s5 }
  0x13   :  { %126 = vmatpush.msra.mxu2 %v104_v27 }
  0x14   :  { %58 = vmatpush.msra.mxu0 %v35_v10 }
  0x15   :  { %127 = vmatpush.msra.mxu2 %v103_v28 }
  0x16   :  { %59 = vmatpush.msra.mxu0 %v34_v11 }
  0x18   :  { %60 = vmatpush.msra.mxu0 %v33_v12 }
  0x1a   :  { %61 = vmatpush.msra.mxu0 %v32_v13 }
  0x1c   :  { %62 = vmatpush.msra.mxu0 %v31_v14 }
  0x1e   :  { %63 = vmatpush.msra.mxu0 %v30_v15 }
  0x20   :  { %64 = vmatpush.msra.mxu0 %v29_v16 }
  0x21   :  { %65 = vmatmul.f32.vlgmr.msra.gmra.mxu0 %v28_v17 }
  0x9e   :  { %v66_v23 = vpop.f32.mrf.mxu0 }
  0x9f   :  { %v67_v24 = vadd.f32 %v206_v22, %v66_v23 }
  0xa1   :  { %v69_v25 = vmax.f32 %v67_v24, 0.0 }
  0xa3   :  { %201 = vmatmul.msk.f32.vlgmr.msra.gmra.mxu1 %vm78_vm0, %v69_v25 }
 0x120   :  { %v99_v30 = vpop.f32.mrf.mxu1 }
 0x121   :  { %v100_v31 = vadd.f32 %v207_v29, %v99_v30 }
 0x123   :  { %v102_v32 = vmax.f32 %v100_v31, 0.0 }
 0x125   :  { %202 = vmatmul.msk.f32.vlgmr.msra.gmra.mxu2 %vm78_vm0, %v102_v32 }
 0x1a8   :  { %v129_v34 = vpop.f32.mrf.mxu2 }
 0x1a9   :  { %v130_v35 = vadd.f32 %v129_v34, %v108_v33 }
 0x1ab   :  { %v203_v36 = vmul.f32 -1.442695, %v130_v35 }
 0x1ad   :  { %208 = vpow2.f32 %v203_v36 }
 0x1b3   :  { %v209_v37 = vpop.eup %208 }
 0x1b4   :  { %v135_v38 = vadd.f32 1.0, %v209_v37 }
 0x1b6   :  { %210 = vrcp.f32 %v135_v38  ;;  %v147_v42 = vand.u32 2147483648, %v135_v38  ;;  %v145_v44 = vand.u32 2147483647, %v135_v38  ;;  %vm141_vm2 = vweird.f32 %v135_v38 }
 0x1b8   :  { %v148_v46 = vor.u32 1.1754944e-38, %v147_v42  ;;  %vm146_vm4 = vcmp.eq.f32.partialorder %v145_v44, 8.507059e+37 }
 0x1bc   :  { %v211_v39 = vpop.eup %210 }
 0x1bd   :  { %v137_v40 = vmul.f32 %v211_v39, %v135_v38  ;;  %vm142_vm1 = vweird.f32 %v211_v39 }
 0x1be   :  { %vm143_vm3 = vmor %vm141_vm2, %vm142_vm1 }
 0x1bf   :  { %v138_v41 = vsub.f32 1.0, %v137_v40 }
 0x1c1   :  { %v139_v43 = vmul.f32 %v211_v39, %v138_v41 }
 0x1c3   :  { %v140_v45 = vadd.f32 %v211_v39, %v139_v43 }
 0x1c5   :  { %v144_v47 = vsel %vm143_vm3, %v211_v39, %v140_v45 }
 0x1c6   :  { %v149_v48 = vsel %vm146_vm4, %v148_v46, %v144_v47 }
 0x1c7   :  { %151 = vxpose.xlu0.b32.start.end [1/1] (short) (narrow) %v149_v48, 8 }
 0x26b   :  { %v167_v49 = vpop.trf.xlu0 }
 0x26c   :  { %184 = vst.msk [vmem:[#allocation3] sm:$0xf] %vm183_vm5, %v167_v49 }
 0x26d   :  { %195 = dma.vmem_to_hbm [thread:$0]  %s191_s5, 64, %s193_s8, [#allocation4]  }
 0x26e   :  { %236 = dma.done.wait [#allocation4], 64  }
 0x26f   :  { %237 = vsyncadd [#allocation4], 4294967232 }
 0x270   :  { %200 = vsyncpa [#allocation4], 1 }

</bundles_post_ra>
